<compile_context>
chip_gen: v5e
topology: v5e:2x2
jax: 0.10.0
libtpu: 0.0.40
codegen_flags: <defaults>
</compile_context>

<pallas_src>
import jax
import jax.numpy as jnp
from jax.experimental import pallas as pl
from jax.experimental.pallas import tpu as pltpu

_NEG_BIG = -1e30   # effectively -inf for masked (padded) logit lanes
_LANE = 128        # TPU lane width
_SUBLANE = 8       # TPU sublane width


def actor_v2_kernel(obs_ref, w1_ref, b1_ref, w2_ref, b2_ref, w3_ref, b3_ref,
                    out_ref):
    # obs arrives as f32; cast to bf16 here (rides a VPU slot with slack) so we
    # avoid an extra host-side pad+cast pass over obs in HBM.
    x = obs_ref[...].astype(jnp.bfloat16)

    # preprocess_net: two Linear+ReLU layers (bf16 operands on MXU, f32 acc).
    h = jnp.dot(x, w1_ref[...], preferred_element_type=jnp.float32)
    h = jnp.maximum(h + b1_ref[...], 0.0)
    h = jnp.dot(h.astype(jnp.bfloat16), w2_ref[...],
                preferred_element_type=jnp.float32)
    h = jnp.maximum(h + b2_ref[...], 0.0)

    # last: single Linear (hidden -> padded action_dim). Padded w3 columns are
    # zero and padded b3 lanes are -1e30, so padded logits behave like -inf.
    logits = jnp.dot(h.astype(jnp.bfloat16), w3_ref[...],
                     preferred_element_type=jnp.float32)
    logits = logits + b3_ref[...]

    # Numerically stable softmax over the (lane-dense) padded action axis.
    m = jnp.max(logits, axis=-1, keepdims=True)
    e = jnp.exp(logits - m)
    denom = jnp.sum(e, axis=-1, keepdims=True)
    out_ref[...] = (e * pl.reciprocal(denom, approx=False)).astype(out_ref.dtype)


def prepare_params(params):
    """One-time parameter prep hoisted out of the per-call path.

    Casts weights to bf16 and lane-pads the last layer (w3 columns zero,
    b3 pad lanes -1e30) so the forward pass never re-reads/re-writes weights.
    """
    w1, b1, w2, b2, w3, b3 = (params["w1"], params["b1"], params["w2"],
                              params["b2"], params["w3"], params["b3"])
    obs_dim, hidden = int(w1.shape[0]), int(w1.shape[1])
    action_dim = int(w3.shape[1])
    a_pad = pl.cdiv(action_dim, _LANE) * _LANE

    w3_p = jnp.zeros((hidden, a_pad), jnp.bfloat16).at[:, :action_dim].set(
        w3.astype(jnp.bfloat16))
    b3_p = jnp.full((1, a_pad), _NEG_BIG, jnp.float32).at[:, :action_dim].set(
        jnp.reshape(b3, (1, -1)).astype(jnp.float32))

    return {
        "w1": w1.astype(jnp.bfloat16),
        "b1": jnp.reshape(b1, (1, -1)).astype(jnp.float32),
        "w2": w2.astype(jnp.bfloat16),
        "b2": jnp.reshape(b2, (1, -1)).astype(jnp.float32),
        "w3": w3_p,
        "b3": b3_p,
        "obs_dim": obs_dim,
        "hidden": hidden,
        "action_dim": action_dim,
        "a_pad": a_pad,
    }


def _choose_block_b(batch, max_block=512):
    """Batch tile: big enough to amortize per-step overhead, >=2 (ideally >=4)
    grid steps at large B so the parallel axis can shard across v7x's 2 TCs."""
    b8 = pl.cdiv(batch, _SUBLANE) * _SUBLANE
    if b8 <= _LANE:
        return int(b8)                 # tiny batch: single small grid step
    if b8 <= 2 * _LANE:
        return _LANE                   # two steps
    cand = pl.cdiv(pl.cdiv(b8, 4), _LANE) * _LANE   # aim for >= 4 steps
    return int(min(max_block, max(_LANE, cand)))


def actor_v2_forward(obs, prep, *, block_b=None, out_dtype=jnp.float32,
                     return_padded=False, state=None):
    """obs: [B, obs_dim] float32, prep: output of prepare_params.

    Returns (probs [B, action_dim], state). With return_padded=True the
    lane-padded [b_pad, a_pad] buffer is returned instead (padded lanes are
    exactly 0) so a consumer can fuse the slice and skip an HBM pass.
    """
    B, obs_dim = obs.shape
    assert obs_dim == prep["obs_dim"]
    hidden, a_pad, action_dim = prep["hidden"], prep["a_pad"], prep["action_dim"]

    if block_b is None:
        block_b = _choose_block_b(B)
    b_pad = pl.cdiv(B, block_b) * block_b

    obs_f32 = obs.astype(jnp.float32)
    if b_pad != B:
        # Only the last tile carries padded rows (zero obs -> valid softmax
        # rows that are sliced off below).
        obs_f32 = jnp.pad(obs_f32, ((0, b_pad - B), (0, 0)))

    grid = (b_pad // block_b,)

    # Explicit VMEM budget: weights (budget 2x to also cover the non-Buffered
    # fallback) + biases + double-buffered obs/out tiles + activation headroom.
    out_itemsize = jnp.dtype(out_dtype).itemsize
    weight_bytes = 2 * 2 * (obs_dim * hidden + hidden * hidden + hidden * a_pad)
    bias_bytes = 4 * (2 * hidden + a_pad)
    io_bytes = 2 * block_b * obs_dim * 4 + 2 * block_b * a_pad * out_itemsize
    act_bytes = block_b * (2 * hidden + 3 * a_pad) * 4
    vmem_limit = weight_bytes + bias_bytes + io_bytes + act_bytes + (2 << 20)
    vmem_limit = int(min(max(vmem_limit, 4 << 20), 48 << 20))  # v7x: 64 MiB phys

    args = (obs_f32, prep["w1"], prep["b1"], prep["w2"], prep["b2"],
            prep["w3"], prep["b3"])

    def build_and_run(single_buffer_weights):
        if single_buffer_weights:
            # Constant blocks never change -> single buffer halves their VMEM.
            def const_spec(shape):
                return pl.BlockSpec(shape, lambda i: (0, 0),
                                    pipeline_mode=pl.Buffered(1))
        else:
            def const_spec(shape):
                return pl.BlockSpec(shape, lambda i: (0, 0))

        call = pl.pallas_call(
            actor_v2_kernel,
            out_shape=jax.ShapeDtypeStruct((b_pad, a_pad), out_dtype),
            grid_spec=pltpu.PrefetchScalarGridSpec(
                num_scalar_prefetch=0,
                grid=grid,
                in_specs=[
                    # activations: pipelined per batch tile
                    pl.BlockSpec((block_b, obs_dim), lambda i: (i, 0)),
                    # weights / biases: constant index_map -> VMEM-resident
                    const_spec((obs_dim, hidden)),
                    const_spec((1, hidden)),
                    const_spec((hidden, hidden)),
                    const_spec((1, hidden)),
                    const_spec((hidden, a_pad)),
                    const_spec((1, a_pad)),
                ],
                out_specs=pl.BlockSpec((block_b, a_pad), lambda i: (i, 0)),
            ),
            compiler_params=pltpu.CompilerParams(
                dimension_semantics=("parallel",),
                vmem_limit_bytes=vmem_limit),
        )
        return call(*args)

    try:
        probs_p = build_and_run(single_buffer_weights=True)
    except Exception:
        # pl.Buffered(1) not supported by this jax build -> default pipelining.
        probs_p = build_and_run(single_buffer_weights=False)

    if return_padded:
        return probs_p, state
    # Slice away batch padding and lane padding; logits.view(B, -1) is already
    # [B, action_dim]; softmax applied in-kernel.
    return probs_p[:B, :action_dim], state  # state (h) passes through unchanged


def init_params(key, obs_dim, hidden, action_dim):
    k1, k2, k3 = jax.random.split(key, 3)

    def lin(k, fan_in, fan_out):
        w = jax.random.normal(k, (fan_in, fan_out), jnp.float32) * (
            1.0 / jnp.sqrt(fan_in))
        b = jnp.zeros((1, fan_out), jnp.float32)
        return w, b

    w1, b1 = lin(k1, obs_dim, hidden)
    w2, b2 = lin(k2, hidden, hidden)
    w3, b3 = lin(k3, hidden, action_dim)
    return {"w1": w1, "b1": b1, "w2": w2, "b2": b2, "w3": w3, "b3": b3}


def _reference_f32(obs, p):
    h = jnp.maximum(obs @ p["w1"] + p["b1"], 0.0)
    h = jnp.maximum(h @ p["w2"] + p["b2"], 0.0)
    logits = h @ p["w3"] + p["b3"]
    return jax.nn.softmax(logits, axis=-1)


def _reference_bf16(obs, p):
    bf16, f32 = jnp.bfloat16, jnp.float32
    h = jnp.dot(obs.astype(bf16), p["w1"].astype(bf16),
                preferred_element_type=f32) + p["b1"]
    h = jnp.maximum(h, 0.0)
    h = jnp.dot(h.astype(bf16), p["w2"].astype(bf16),
                preferred_element_type=f32) + p["b2"]
    h = jnp.maximum(h, 0.0)
    logits = jnp.dot(h.astype(bf16), p["w3"].astype(bf16),
                     preferred_element_type=f32) + p["b3"]
    return jax.nn.softmax(logits, axis=-1)


if __name__ == "__main__":
    B, OBS_DIM, HIDDEN, ACTION_DIM = 8, 32, 64, 16

    key = jax.random.PRNGKey(0)
    k_obs, k_params = jax.random.split(key)
    obs = jax.random.normal(k_obs, (B, OBS_DIM), jnp.float32)
    params = init_params(k_params, OBS_DIM, HIDDEN, ACTION_DIM)

    # One-time parameter prep (bf16 cast + lane padding), hoisted out of forward.
    prep = prepare_params(params)

    probs, state = actor_v2_forward(obs, prep)
    probs = jax.block_until_ready(probs)

    assert probs.shape == (B, ACTION_DIM)
    assert state is None
    # tight check against a bf16-matmul / f32-accumulate reference (same math)
    ref_bf16 = _reference_bf16(obs, params)
    assert jnp.allclose(probs, ref_bf16, atol=5e-3, rtol=5e-3)
    # looser check against the pure-f32 module semantics
    ref_f32 = _reference_f32(obs, params)
    assert jnp.allclose(probs, ref_f32, atol=3e-2, rtol=3e-2)
    # rows of a softmax sum to 1 (padded lanes contribute exactly 0)
    assert jnp.allclose(jnp.sum(probs, axis=-1), jnp.ones((B,)), atol=1e-5)

    print("KERNEL_OK")
</pallas_src>

<mosaic_0001>
module attributes {stable_mosaic.version = 11 : i64} {
  func.func @actor_v2_kernel(%arg0: i32, %arg1: memref<8x32xf32, #tpu.memory_space<vmem>>, %arg2: memref<32x64xbf16, #tpu.memory_space<vmem>>, %arg3: memref<1x64xf32, #tpu.memory_space<vmem>>, %arg4: memref<64x64xbf16, #tpu.memory_space<vmem>>, %arg5: memref<1x64xf32, #tpu.memory_space<vmem>>, %arg6: memref<64x128xbf16, #tpu.memory_space<vmem>>, %arg7: memref<1x128xf32, #tpu.memory_space<vmem>>, %arg8: memref<8x128xf32, #tpu.memory_space<vmem>>) attributes {dimension_semantics = [#tpu.dimension_semantics<parallel>], iteration_bounds = array<i64: 1>, scalar_prefetch = 0 : i64, scratch_operands = 0 : i64, tpu.core_type = #tpu.core_type<tc>, window_params = [{transform_indices = @transform_0, window_bounds = array<i64: 8, 32>}, {pipeline_mode = #tpu.pipeline_mode<synchronous>, transform_indices = @transform_1, window_bounds = array<i64: 32, 64>}, {pipeline_mode = #tpu.pipeline_mode<synchronous>, transform_indices = @transform_2, window_bounds = array<i64: 1, 64>}, {pipeline_mode = #tpu.pipeline_mode<synchronous>, transform_indices = @transform_3, window_bounds = array<i64: 64, 64>}, {pipeline_mode = #tpu.pipeline_mode<synchronous>, transform_indices = @transform_4, window_bounds = array<i64: 1, 64>}, {pipeline_mode = #tpu.pipeline_mode<synchronous>, transform_indices = @transform_5, window_bounds = array<i64: 64, 128>}, {pipeline_mode = #tpu.pipeline_mode<synchronous>, transform_indices = @transform_6, window_bounds = array<i64: 1, 128>}, {transform_indices = @transform_7, window_bounds = array<i64: 8, 128>}]} {
    %c0 = arith.constant 0 : index
    %c0_0 = arith.constant 0 : index
    %0 = vector.load %arg1[%c0, %c0_0] : memref<8x32xf32, #tpu.memory_space<vmem>>, vector<8x32xf32>
    %1 = arith.truncf %0 : vector<8x32xf32> to vector<8x32xbf16>
    %c0_1 = arith.constant 0 : index
    %c0_2 = arith.constant 0 : index
    %2 = vector.load %arg2[%c0_1, %c0_2] : memref<32x64xbf16, #tpu.memory_space<vmem>>, vector<32x64xbf16>
    %cst = arith.constant dense<0.000000e+00> : vector<8x64xf32>
    %3 = tpu.matmul %1, %2, %cst {dimension_numbers = #tpu.dot_dimension_numbers<[1], [0], [0], [1], [0, 0, 1, 1], [], []>} : vector<8x32xbf16>, vector<32x64xbf16>, vector<8x64xf32> -> vector<8x64xf32>
    %c0_3 = arith.constant 0 : index
    %c0_4 = arith.constant 0 : index
    %4 = vector.load %arg3[%c0_3, %c0_4] : memref<1x64xf32, #tpu.memory_space<vmem>>, vector<1x64xf32>
    %5 = vector.broadcast %4 : vector<1x64xf32> to vector<8x64xf32>
    %6 = arith.addf %3, %5 : vector<8x64xf32>
    %cst_5 = arith.constant 0.000000e+00 : f32
    %7 = vector.broadcast %cst_5 : f32 to vector<8x64xf32>
    %8 = arith.maximumf %6, %7 : vector<8x64xf32>
    %9 = arith.truncf %8 : vector<8x64xf32> to vector<8x64xbf16>
    %c0_6 = arith.constant 0 : index
    %c0_7 = arith.constant 0 : index
    %10 = vector.load %arg4[%c0_6, %c0_7] : memref<64x64xbf16, #tpu.memory_space<vmem>>, vector<64x64xbf16>
    %cst_8 = arith.constant dense<0.000000e+00> : vector<8x64xf32>
    %11 = tpu.matmul %9, %10, %cst_8 {dimension_numbers = #tpu.dot_dimension_numbers<[1], [0], [0], [1], [0, 0, 1, 1], [], []>} : vector<8x64xbf16>, vector<64x64xbf16>, vector<8x64xf32> -> vector<8x64xf32>
    %c0_9 = arith.constant 0 : index
    %c0_10 = arith.constant 0 : index
    %12 = vector.load %arg5[%c0_9, %c0_10] : memref<1x64xf32, #tpu.memory_space<vmem>>, vector<1x64xf32>
    %13 = vector.broadcast %12 : vector<1x64xf32> to vector<8x64xf32>
    %14 = arith.addf %11, %13 : vector<8x64xf32>
    %cst_11 = arith.constant 0.000000e+00 : f32
    %15 = vector.broadcast %cst_11 : f32 to vector<8x64xf32>
    %16 = arith.maximumf %14, %15 : vector<8x64xf32>
    %17 = arith.truncf %16 : vector<8x64xf32> to vector<8x64xbf16>
    %c0_12 = arith.constant 0 : index
    %c0_13 = arith.constant 0 : index
    %18 = vector.load %arg6[%c0_12, %c0_13] : memref<64x128xbf16, #tpu.memory_space<vmem>>, vector<64x128xbf16>
    %cst_14 = arith.constant dense<0.000000e+00> : vector<8x128xf32>
    %19 = tpu.matmul %17, %18, %cst_14 {dimension_numbers = #tpu.dot_dimension_numbers<[1], [0], [0], [1], [0, 0, 1, 1], [], []>} : vector<8x64xbf16>, vector<64x128xbf16>, vector<8x128xf32> -> vector<8x128xf32>
    %c0_15 = arith.constant 0 : index
    %c0_16 = arith.constant 0 : index
    %20 = vector.load %arg7[%c0_15, %c0_16] : memref<1x128xf32, #tpu.memory_space<vmem>>, vector<1x128xf32>
    %21 = vector.broadcast %20 : vector<1x128xf32> to vector<8x128xf32>
    %22 = arith.addf %19, %21 : vector<8x128xf32>
    %cst_17 = arith.constant dense<0xFF800000> : vector<8xf32>
    %23 = vector.multi_reduction <maximumf>, %22, %cst_17 [1] : vector<8x128xf32> to vector<8xf32>
    %24 = vector.shape_cast %23 : vector<8xf32> to vector<8x1xf32>
    %25 = vector.broadcast %24 : vector<8x1xf32> to vector<8x128xf32>
    %26 = arith.subf %22, %25 : vector<8x128xf32>
    %27 = math.exp %26 : vector<8x128xf32>
    %cst_18 = arith.constant dense<0.000000e+00> : vector<8xf32>
    %28 = vector.multi_reduction <add>, %27, %cst_18 [1] : vector<8x128xf32> to vector<8xf32>
    %29 = vector.shape_cast %28 : vector<8xf32> to vector<8x1xf32>
    %30 = tpu.reciprocal %29 : vector<8x1xf32> -> vector<8x1xf32>
    %31 = vector.broadcast %30 : vector<8x1xf32> to vector<8x128xf32>
    %32 = arith.mulf %27, %31 : vector<8x128xf32>
    %c0_19 = arith.constant 0 : index
    %c0_20 = arith.constant 0 : index
    %33 = vector.load %arg8[%c0_19, %c0_20] : memref<8x128xf32, #tpu.memory_space<vmem>>, vector<8x128xf32>
    tpu.vector_store %arg8[%c0_19, %c0_20], %32 {strides = array<i32>} : memref<8x128xf32, #tpu.memory_space<vmem>>, vector<8x128xf32>,
    return
  }
  func.func @transform_0(%arg0: i32) -> (i32, i32) {
    %c0_i32 = arith.constant 0 : i32
    %c0_i32_0 = arith.constant 0 : i32
    return %arg0, %c0_i32 : i32, i32
  }
  func.func @transform_1(%arg0: i32) -> (i32, i32) {
    %c0_i32 = arith.constant 0 : i32
    %c0_i32_0 = arith.constant 0 : i32
    %c0_i32_1 = arith.constant 0 : i32
    return %c0_i32, %c0_i32_0 : i32, i32
  }
  func.func @transform_2(%arg0: i32) -> (i32, i32) {
    %c0_i32 = arith.constant 0 : i32
    %c0_i32_0 = arith.constant 0 : i32
    %c0_i32_1 = arith.constant 0 : i32
    return %c0_i32, %c0_i32_0 : i32, i32
  }
  func.func @transform_3(%arg0: i32) -> (i32, i32) {
    %c0_i32 = arith.constant 0 : i32
    %c0_i32_0 = arith.constant 0 : i32
    %c0_i32_1 = arith.constant 0 : i32
    return %c0_i32, %c0_i32_0 : i32, i32
  }
  func.func @transform_4(%arg0: i32) -> (i32, i32) {
    %c0_i32 = arith.constant 0 : i32
    %c0_i32_0 = arith.constant 0 : i32
    %c0_i32_1 = arith.constant 0 : i32
    return %c0_i32, %c0_i32_0 : i32, i32
  }
  func.func @transform_5(%arg0: i32) -> (i32, i32) {
    %c0_i32 = arith.constant 0 : i32
    %c0_i32_0 = arith.constant 0 : i32
    %c0_i32_1 = arith.constant 0 : i32
    return %c0_i32, %c0_i32_0 : i32, i32
  }
  func.func @transform_6(%arg0: i32) -> (i32, i32) {
    %c0_i32 = arith.constant 0 : i32
    %c0_i32_0 = arith.constant 0 : i32
    %c0_i32_1 = arith.constant 0 : i32
    return %c0_i32, %c0_i32_0 : i32, i32
  }
  func.func @transform_7(%arg0: i32) -> (i32, i32) {
    %c0_i32 = arith.constant 0 : i32
    %c0_i32_0 = arith.constant 0 : i32
    return %arg0, %c0_i32 : i32, i32
  }
}

module attributes {stable_mosaic.version = 11 : i64} {
  func.func @actor_v2_kernel(%arg0: i32, %arg1: memref<8x32xf32, #tpu.memory_space<vmem>>, %arg2: memref<32x64xbf16, #tpu.memory_space<vmem>>, %arg3: memref<1x64xf32, #tpu.memory_space<vmem>>, %arg4: memref<64x64xbf16, #tpu.memory_space<vmem>>, %arg5: memref<1x64xf32, #tpu.memory_space<vmem>>, %arg6: memref<64x128xbf16, #tpu.memory_space<vmem>>, %arg7: memref<1x128xf32, #tpu.memory_space<vmem>>, %arg8: memref<8x128xf32, #tpu.memory_space<vmem>>) attributes {dimension_semantics = [#tpu.dimension_semantics<parallel>], iteration_bounds = array<i64: 1>, scalar_prefetch = 0 : i64, scratch_operands = 0 : i64, tpu.core_type = #tpu.core_type<tc>, window_params = [{transform_indices = @transform_0, window_bounds = array<i64: 8, 32>}, {pipeline_mode = #tpu.pipeline_mode<synchronous>, transform_indices = @transform_1, window_bounds = array<i64: 32, 64>}, {pipeline_mode = #tpu.pipeline_mode<synchronous>, transform_indices = @transform_2, window_bounds = array<i64: 1, 64>}, {pipeline_mode = #tpu.pipeline_mode<synchronous>, transform_indices = @transform_3, window_bounds = array<i64: 64, 64>}, {pipeline_mode = #tpu.pipeline_mode<synchronous>, transform_indices = @transform_4, window_bounds = array<i64: 1, 64>}, {pipeline_mode = #tpu.pipeline_mode<synchronous>, transform_indices = @transform_5, window_bounds = array<i64: 64, 128>}, {pipeline_mode = #tpu.pipeline_mode<synchronous>, transform_indices = @transform_6, window_bounds = array<i64: 1, 128>}, {transform_indices = @transform_7, window_bounds = array<i64: 8, 128>}]} {
    %c0 = arith.constant 0 : index
    %c0_0 = arith.constant 0 : index
    %0 = vector.load %arg1[%c0, %c0_0] : memref<8x32xf32, #tpu.memory_space<vmem>>, vector<8x32xf32>
    %1 = arith.truncf %0 : vector<8x32xf32> to vector<8x32xbf16>
    %c0_1 = arith.constant 0 : index
    %c0_2 = arith.constant 0 : index
    %2 = vector.load %arg2[%c0_1, %c0_2] : memref<32x64xbf16, #tpu.memory_space<vmem>>, vector<32x64xbf16>
    %cst = arith.constant dense<0.000000e+00> : vector<8x64xf32>
    %3 = tpu.matmul %1, %2, %cst {dimension_numbers = #tpu.dot_dimension_numbers<[1], [0], [0], [1], [0, 0, 1, 1], [], []>} : vector<8x32xbf16>, vector<32x64xbf16>, vector<8x64xf32> -> vector<8x64xf32>
    %c0_3 = arith.constant 0 : index
    %c0_4 = arith.constant 0 : index
    %4 = vector.load %arg3[%c0_3, %c0_4] : memref<1x64xf32, #tpu.memory_space<vmem>>, vector<1x64xf32>
    %5 = vector.broadcast %4 : vector<1x64xf32> to vector<8x64xf32>
    %6 = arith.addf %3, %5 : vector<8x64xf32>
    %cst_5 = arith.constant 0.000000e+00 : f32
    %7 = vector.broadcast %cst_5 : f32 to vector<8x64xf32>
    %8 = arith.maximumf %6, %7 : vector<8x64xf32>
    %9 = arith.truncf %8 : vector<8x64xf32> to vector<8x64xbf16>
    %c0_6 = arith.constant 0 : index
    %c0_7 = arith.constant 0 : index
    %10 = vector.load %arg4[%c0_6, %c0_7] : memref<64x64xbf16, #tpu.memory_space<vmem>>, vector<64x64xbf16>
    %cst_8 = arith.constant dense<0.000000e+00> : vector<8x64xf32>
    %11 = tpu.matmul %9, %10, %cst_8 {dimension_numbers = #tpu.dot_dimension_numbers<[1], [0], [0], [1], [0, 0, 1, 1], [], []>} : vector<8x64xbf16>, vector<64x64xbf16>, vector<8x64xf32> -> vector<8x64xf32>
    %c0_9 = arith.constant 0 : index
    %c0_10 = arith.constant 0 : index
    %12 = vector.load %arg5[%c0_9, %c0_10] : memref<1x64xf32, #tpu.memory_space<vmem>>, vector<1x64xf32>
    %13 = vector.broadcast %12 : vector<1x64xf32> to vector<8x64xf32>
    %14 = arith.addf %11, %13 : vector<8x64xf32>
    %cst_11 = arith.constant 0.000000e+00 : f32
    %15 = vector.broadcast %cst_11 : f32 to vector<8x64xf32>
    %16 = arith.maximumf %14, %15 : vector<8x64xf32>
    %17 = arith.truncf %16 : vector<8x64xf32> to vector<8x64xbf16>
    %c0_12 = arith.constant 0 : index
    %c0_13 = arith.constant 0 : index
    %18 = vector.load %arg6[%c0_12, %c0_13] : memref<64x128xbf16, #tpu.memory_space<vmem>>, vector<64x128xbf16>
    %cst_14 = arith.constant dense<0.000000e+00> : vector<8x128xf32>
    %19 = tpu.matmul %17, %18, %cst_14 {dimension_numbers = #tpu.dot_dimension_numbers<[1], [0], [0], [1], [0, 0, 1, 1], [], []>} : vector<8x64xbf16>, vector<64x128xbf16>, vector<8x128xf32> -> vector<8x128xf32>
    %c0_15 = arith.constant 0 : index
    %c0_16 = arith.constant 0 : index
    %20 = vector.load %arg7[%c0_15, %c0_16] : memref<1x128xf32, #tpu.memory_space<vmem>>, vector<1x128xf32>
    %21 = vector.broadcast %20 : vector<1x128xf32> to vector<8x128xf32>
    %22 = arith.addf %19, %21 : vector<8x128xf32>
    %cst_17 = arith.constant dense<0xFF800000> : vector<8xf32>
    %23 = vector.multi_reduction <maximumf>, %22, %cst_17 [1] : vector<8x128xf32> to vector<8xf32>
    %24 = vector.shape_cast %23 : vector<8xf32> to vector<8x1xf32>
    %25 = vector.broadcast %24 : vector<8x1xf32> to vector<8x128xf32>
    %26 = arith.subf %22, %25 : vector<8x128xf32>
    %27 = math.exp %26 : vector<8x128xf32>
    %cst_18 = arith.constant dense<0.000000e+00> : vector<8xf32>
    %28 = vector.multi_reduction <add>, %27, %cst_18 [1] : vector<8x128xf32> to vector<8xf32>
    %29 = vector.shape_cast %28 : vector<8xf32> to vector<8x1xf32>
    %30 = tpu.reciprocal %29 : vector<8x1xf32> -> vector<8x1xf32>
    %31 = vector.broadcast %30 : vector<8x1xf32> to vector<8x128xf32>
    %32 = arith.mulf %27, %31 : vector<8x128xf32>
    %c0_19 = arith.constant 0 : index
    %c0_20 = arith.constant 0 : index
    %33 = vector.load %arg8[%c0_19, %c0_20] : memref<8x128xf32, #tpu.memory_space<vmem>>, vector<8x128xf32>
    tpu.vector_store %arg8[%c0_19, %c0_20], %32 {strides = array<i32>} : memref<8x128xf32, #tpu.memory_space<vmem>>, vector<8x128xf32>,
    return
  }
  func.func @transform_0(%arg0: i32) -> (i32, i32) {
    %c0_i32 = arith.constant 0 : i32
    %c0_i32_0 = arith.constant 0 : i32
    return %arg0, %c0_i32 : i32, i32
  }
  func.func @transform_1(%arg0: i32) -> (i32, i32) {
    %c0_i32 = arith.constant 0 : i32
    %c0_i32_0 = arith.constant 0 : i32
    %c0_i32_1 = arith.constant 0 : i32
    return %c0_i32, %c0_i32_0 : i32, i32
  }
  func.func @transform_2(%arg0: i32) -> (i32, i32) {
    %c0_i32 = arith.constant 0 : i32
    %c0_i32_0 = arith.constant 0 : i32
    %c0_i32_1 = arith.constant 0 : i32
    return %c0_i32, %c0_i32_0 : i32, i32
  }
  func.func @transform_3(%arg0: i32) -> (i32, i32) {
    %c0_i32 = arith.constant 0 : i32
    %c0_i32_0 = arith.constant 0 : i32
    %c0_i32_1 = arith.constant 0 : i32
    return %c0_i32, %c0_i32_0 : i32, i32
  }
  func.func @transform_4(%arg0: i32) -> (i32, i32) {
    %c0_i32 = arith.constant 0 : i32
    %c0_i32_0 = arith.constant 0 : i32
    %c0_i32_1 = arith.constant 0 : i32
    return %c0_i32, %c0_i32_0 : i32, i32
  }
  func.func @transform_5(%arg0: i32) -> (i32, i32) {
    %c0_i32 = arith.constant 0 : i32
    %c0_i32_0 = arith.constant 0 : i32
    %c0_i32_1 = arith.constant 0 : i32
    return %c0_i32, %c0_i32_0 : i32, i32
  }
  func.func @transform_6(%arg0: i32) -> (i32, i32) {
    %c0_i32 = arith.constant 0 : i32
    %c0_i32_0 = arith.constant 0 : i32
    %c0_i32_1 = arith.constant 0 : i32
    return %c0_i32, %c0_i32_0 : i32, i32
  }
  func.func @transform_7(%arg0: i32) -> (i32, i32) {
    %c0_i32 = arith.constant 0 : i32
    %c0_i32_0 = arith.constant 0 : i32
    return %arg0, %c0_i32 : i32, i32
  }
}

</mosaic_0001>

<bundles_post_ra>
// kernel: tpu_custom_call.1
= control target key start
LH: loop header
LB: loop body
LE: loop exit
PB: predicated region body
PF: predicated region fallthrough
CT: control target
= control target key end

     0   :  { %12 = vsyncpa [#allocation3], 0  ;;  %s545_s0 = inlined_call_operand.hbm [shape: f32[8,32], index: 0, kind: input, shape index: {}]   ;;  %s546_s1 = inlined_call_operand.hbm [shape: bf16[32,64], index: 1, kind: input, shape index: {}]   ;;  %s547_s2 = inlined_call_operand.vmem [shape: f32[1,64], index: 2, kind: input, shape index: {}]   ;;  %s548_s3 = inlined_call_operand.hbm [shape: bf16[64,64], index: 3, kind: input, shape index: {}]   ;;  %s549_s4 = inlined_call_operand.vmem [shape: f32[1,64], index: 4, kind: input, shape index: {}]   ;;  %s550_s5 = inlined_call_operand.hbm [shape: bf16[64,128], index: 5, kind: input, shape index: {}]   ;;  %s551_s6 = inlined_call_operand.vmem [shape: f32[1,128], index: 6, kind: input, shape index: {}]   ;;  %s552_s7 = inlined_call_operand.hbm [shape: f32[8,128], index: 7, kind: output, shape index: {}]  }
   0x1   :  { %13 = vsyncpa [#allocation6], 0 }
   0x2   :  { %14 = vsyncpa [#allocation9], 0  ;;  %s31_s26 = sshll.u32 %s546_s1, 4  ;;  %s32_s26 = int_to_ptr.hbm [resolvable:$true] %s31_s26 }
   0x3   :  { %15 = vsyncpa [#allocation4], 0  ;;  %s474_s27 = smov [#allocation5]   ;;  %s21_s8 = sshll.u32 %s545_s0, 4  ;;  %s22_s8 = int_to_ptr.hbm [resolvable:$true] %s21_s8 }
   0x4   :  { %s33_s28 = sshll.u32 %s474_s27, 4  ;;  %s475_s9 = smov 64   ;;  %s34_s28 = int_to_ptr.vmem [resolvable:$true] %s33_s28 }
   0x5   :  { %s476_s10 = smov 4   ;;  %s477_s11 = smov [#allocation2]  }
   0x6   :  { %39 = dma.hbm_to_vmem [thread:$0]  %s32_s26, 256, %s34_s28, [#allocation6], %s475_s9, %s475_s9, %s476_s10  }
   0x7   :  { %s23_s12 = sshll.u32 %s477_s11, 4  ;;  %s46_s15 = sshll.u32 %s548_s3, 4  ;;  %s24_s12 = int_to_ptr.vmem [resolvable:$true] %s23_s12  ;;  %s47_s15 = int_to_ptr.hbm [resolvable:$true] %s46_s15 }
   0x8   :  { %26 = dma.hbm_to_vmem [thread:$0]  %s22_s8, 128, %s24_s12, [#allocation3]  }
   0x9   :  { %s61_s17 = sshll.u32 %s550_s5, 4  ;;  %s478_s18 = smov [#allocation7]   ;;  %s62_s17 = int_to_ptr.hbm [resolvable:$true] %s61_s17 }
   0xa   :  { %s48_s19 = sshll.u32 %s478_s18, 4  ;;  %s479_s0 = smov [#allocation8]   ;;  %s49_s19 = int_to_ptr.vmem [resolvable:$true] %s48_s19 }
   0xb   :  { %54 = dma.hbm_to_vmem [thread:$0]  %s47_s15, 512, %s49_s19, [#allocation6], %s475_s9, %s475_s9, %s476_s10  }
   0xc   :  { %s63_s20 = sshll.u32 %s479_s0, 4  ;;  %s64_s20 = int_to_ptr.vmem [resolvable:$true] %s63_s20 }
   0xd   :  { %69 = dma.hbm_to_vmem [thread:$0]  %s62_s17, 512, %s64_s20, [#allocation9], %s475_s9, %s475_s9, %s476_s10  }
   0xe   :  { %466 = dma.done.wait [#allocation3], 128  }
   0xf   :  { %467 = vsyncadd [#allocation3], 4294967168 }
  0x10   :  { %468 = dma.done.wait [#allocation6], 768  }
  0x11   :  { %469 = vsyncadd [#allocation6], 4294966528 }
  0x12   :  { %470 = dma.done.wait [#allocation9], 512  }
  0x13   :  { %471 = vsyncadd [#allocation9], 4294966784  ;;  %v323_v0 = vld [vmem:[#allocation5 + $0x8] sm:$0xff]  ;;  %v322_v1 = vld [vmem:[#allocation5] sm:$0xff]  ;;  %vm111_vm0 = vcmask 261120   ;;  %vm166_vm1 = vcmask 523264  }
  0x14   :  { %v327_v2 = vld [vmem:[#allocation7 + $0x18] sm:$0xff]  ;;  %121 = vmatpush.bf16.msra.mxu0 %v323_v0  ;;  %v89_v3 = vld [vmem:[#allocation2] sm:$0xff]  ;;  %v326_v4 = vld [vmem:[#allocation7 + $0x10] sm:$0xff]  ;;  %s267_s26 = sshll.u32 %s552_s7, 4  ;;  %s268_s26 = int_to_ptr.hbm [resolvable:$true] %s267_s26 }
  0x15   :  { %174 = vmatpush.bf16.msra.mxu1 %v327_v2  ;;  %v90_v5 = vpack.c.bf16 %v89_v3, %v89_v3  ;;  %v325_v6 = vld [vmem:[#allocation7 + $0x8] sm:$0xff]  ;;  %v324_v7 = vld [vmem:[#allocation7] sm:$0xff]  ;;  %v331_v8 = vld [vmem:[#allocation8 + $0x18] sm:$0xff] }
  0x16   :  { %228 = vmatpush.bf16.msra.mxu2 %v331_v8  ;;  %v330_v9 = vld [vmem:[#allocation8 + $0x10] sm:$0xff]  ;;  %v339_v10 = vld [vmem:[%s547_s2] ss:$0 sm:$0xff]  ;;  %v328_v17 = vld [vmem:[#allocation8] sm:$0xff] }
  0x17   :  { %v329_v16 = vld [vmem:[#allocation8 + $0x8] sm:$0xff] }
  0x18   :  { %122 = vmatpush.bf16.msra.mxu0 %v322_v1  ;;  %v340_v18 = vld [vmem:[%s549_s4] ss:$0 sm:$0xff]  ;;  %s480_s4 = smov [#allocation10]  }
  0x19   :  { %175 = vmatpush.bf16.msra.mxu1 %v326_v4  ;;  %v341_v24 = vld [vmem:[%s551_s6] ss:$0 sm:$0xff]  ;;  %s265_s6 = sshll.u32 %s480_s4, 4  ;;  %s266_s6 = int_to_ptr.vmem [resolvable:$true] %s265_s6 }
  0x1a   :  { %229 = vmatpush.bf16.msra.mxu2 %v330_v9 }
  0x1b   :  { %287 = vmatmul.msk.bf16.vlgmr.msra.gmra.mxu0 %vm111_vm0, %v90_v5 }
  0x1d   :  { %176 = vmatpush.bf16.msra.mxu1 %v325_v6 }
  0x1e   :  { %230 = vmatpush.bf16.msra.mxu2 %v329_v16 }
  0x21   :  { %177 = vmatpush.bf16.msra.mxu1 %v324_v7 }
  0x22   :  { %231 = vmatpush.bf16.msra.mxu2 %v328_v17 }
  0x98   :  { %v124_v11 = vpop.f32.mrf.mxu0 }
  0x99   :  { %v125_v12 = vadd.f32 %v339_v10, %v124_v11 }
  0x9b   :  { %v128_v13 = vmax.f32 %v125_v12, 0.0 }
  0x9d   :  { %v129_v14 = vpack.c.bf16 %v128_v13, %v128_v13 }
  0x9f   :  { %304 = vmatmul.msk.bf16.vlgmr.msra.gmra.mxu1 %vm166_vm1, %v129_v14 }
  0xa0   :  { %v126_v15 = vpop.f32.mrf.mxu0 }
 0x11c   :  { %v179_v19 = vpop.f32.mrf.mxu1 }
 0x11d   :  { %v180_v20 = vadd.f32 %v340_v18, %v179_v19 }
 0x11f   :  { %v183_v21 = vmax.f32 %v180_v20, 0.0 }
 0x121   :  { %v184_v22 = vpack.c.bf16 %v183_v21, %v183_v21 }
 0x123   :  { %321 = vmatmul.msk.bf16.vlgmr.msra.gmra.mxu2 %vm166_vm1, %v184_v22 }
 0x124   :  { %v181_v23 = vpop.f32.mrf.mxu1 }
 0x1a6   :  { %v233_v25 = vpop.f32.mrf.mxu2 }
 0x1a7   :  { %v234_v26 = vadd.f32 %v341_v24, %v233_v25 }
 0x1a9   :  { %237 = vmax.xlane.f32.xlu0 %v234_v26 }
 0x1ae   :  { %v235_v27 = vpop.f32.mrf.mxu2 }
 0x21c   :  { %v238_v28 = vpop.xlane.xlu0 %237 }
 0x21d   :  { %v239_v29 = vsub.f32 %v234_v26, %v238_v28 }
 0x21f   :  { %v240_v30 = vmul.f32 1.442695, %v239_v29 }
 0x221   :  { %342 = vpow2.f32 %v240_v30 }
 0x227   :  { %v343_v31 = vpop.eup %342 }
 0x228   :  { %242 = vadd.xlane.f32.xlu0 %v343_v31 }
 0x29b   :  { %v243_v32 = vpop.xlane.xlu0 %242 }
 0x29c   :  { %344 = vrcp.f32 %v243_v32  ;;  %v255_v36 = vand.u32 2147483648, %v243_v32  ;;  %v253_v38 = vand.u32 2147483647, %v243_v32  ;;  %vm249_vm3 = vweird.f32 %v243_v32 }
 0x29e   :  { %v256_v40 = vor.u32 1.1754944e-38, %v255_v36  ;;  %vm254_vm5 = vcmp.eq.f32.partialorder %v253_v38, 8.507059e+37 }
 0x2a2   :  { %v345_v33 = vpop.eup %344 }
 0x2a3   :  { %v245_v34 = vmul.f32 %v345_v33, %v243_v32  ;;  %vm250_vm2 = vweird.f32 %v345_v33 }
 0x2a4   :  { %vm251_vm4 = vmor %vm249_vm3, %vm250_vm2 }
 0x2a5   :  { %v246_v35 = vsub.f32 1.0, %v245_v34 }
 0x2a7   :  { %v247_v37 = vmul.f32 %v345_v33, %v246_v35 }
 0x2a9   :  { %v248_v39 = vadd.f32 %v345_v33, %v247_v37 }
 0x2ab   :  { %v252_v41 = vsel %vm251_vm4, %v345_v33, %v248_v39 }
 0x2ac   :  { %v257_v42 = vsel %vm254_vm5, %v256_v40, %v252_v41 }
 0x2ad   :  { %v258_v43 = vmul.f32 %v343_v31, %v257_v42 }
 0x2af   :  { %259 = vst [vmem:[#allocation10] sm:$0xff] %v258_v43 }
 0x2b0   :  { %270 = dma.vmem_to_hbm [thread:$0]  %s266_s6, 128, %s268_s26, [#allocation4]  }
 0x2b1   :  { %472 = dma.done.wait [#allocation4], 128  }
 0x2b2   :  { %473 = vsyncadd [#allocation4], 4294967168 }
 0x2b3   :  { %275 = vsyncpa [#allocation3], 1 }
 0x2b4   :  { %276 = vsyncpa [#allocation6], 1 }
 0x2b5   :  { %277 = vsyncpa [#allocation9], 1 }
 0x2b6   :  { %278 = vsyncpa [#allocation4], 1 }

// kernel: tpu_custom_call.1
= control target key start
LH: loop header
LB: loop body
LE: loop exit
PB: predicated region body
PF: predicated region fallthrough
CT: control target
= control target key end

     0   :  { %12 = vsyncpa [#allocation3], 0  ;;  %s545_s0 = inlined_call_operand.hbm [shape: f32[8,32], index: 0, kind: input, shape index: {}]   ;;  %s546_s1 = inlined_call_operand.hbm [shape: bf16[32,64], index: 1, kind: input, shape index: {}]   ;;  %s547_s2 = inlined_call_operand.vmem [shape: f32[1,64], index: 2, kind: input, shape index: {}]   ;;  %s548_s3 = inlined_call_operand.hbm [shape: bf16[64,64], index: 3, kind: input, shape index: {}]   ;;  %s549_s4 = inlined_call_operand.vmem [shape: f32[1,64], index: 4, kind: input, shape index: {}]   ;;  %s550_s5 = inlined_call_operand.hbm [shape: bf16[64,128], index: 5, kind: input, shape index: {}]   ;;  %s551_s6 = inlined_call_operand.vmem [shape: f32[1,128], index: 6, kind: input, shape index: {}]   ;;  %s552_s7 = inlined_call_operand.hbm [shape: f32[8,128], index: 7, kind: output, shape index: {}]  }
   0x1   :  { %13 = vsyncpa [#allocation6], 0 }
   0x2   :  { %14 = vsyncpa [#allocation9], 0  ;;  %s31_s26 = sshll.u32 %s546_s1, 4  ;;  %s32_s26 = int_to_ptr.hbm [resolvable:$true] %s31_s26 }
   0x3   :  { %15 = vsyncpa [#allocation4], 0  ;;  %s474_s27 = smov [#allocation5]   ;;  %s21_s8 = sshll.u32 %s545_s0, 4  ;;  %s22_s8 = int_to_ptr.hbm [resolvable:$true] %s21_s8 }
   0x4   :  { %s33_s28 = sshll.u32 %s474_s27, 4  ;;  %s475_s9 = smov 64   ;;  %s34_s28 = int_to_ptr.vmem [resolvable:$true] %s33_s28 }
   0x5   :  { %s476_s10 = smov 4   ;;  %s477_s11 = smov [#allocation2]  }
   0x6   :  { %39 = dma.hbm_to_vmem [thread:$0]  %s32_s26, 256, %s34_s28, [#allocation6], %s475_s9, %s475_s9, %s476_s10  }
   0x7   :  { %s23_s12 = sshll.u32 %s477_s11, 4  ;;  %s46_s15 = sshll.u32 %s548_s3, 4  ;;  %s24_s12 = int_to_ptr.vmem [resolvable:$true] %s23_s12  ;;  %s47_s15 = int_to_ptr.hbm [resolvable:$true] %s46_s15 }
   0x8   :  { %26 = dma.hbm_to_vmem [thread:$0]  %s22_s8, 128, %s24_s12, [#allocation3]  }
   0x9   :  { %s61_s17 = sshll.u32 %s550_s5, 4  ;;  %s478_s18 = smov [#allocation7]   ;;  %s62_s17 = int_to_ptr.hbm [resolvable:$true] %s61_s17 }
   0xa   :  { %s48_s19 = sshll.u32 %s478_s18, 4  ;;  %s479_s0 = smov [#allocation8]   ;;  %s49_s19 = int_to_ptr.vmem [resolvable:$true] %s48_s19 }
   0xb   :  { %54 = dma.hbm_to_vmem [thread:$0]  %s47_s15, 512, %s49_s19, [#allocation6], %s475_s9, %s475_s9, %s476_s10  }
   0xc   :  { %s63_s20 = sshll.u32 %s479_s0, 4  ;;  %s64_s20 = int_to_ptr.vmem [resolvable:$true] %s63_s20 }
   0xd   :  { %69 = dma.hbm_to_vmem [thread:$0]  %s62_s17, 512, %s64_s20, [#allocation9], %s475_s9, %s475_s9, %s476_s10  }
   0xe   :  { %466 = dma.done.wait [#allocation3], 128  }
   0xf   :  { %467 = vsyncadd [#allocation3], 4294967168 }
  0x10   :  { %468 = dma.done.wait [#allocation6], 768  }
  0x11   :  { %469 = vsyncadd [#allocation6], 4294966528 }
  0x12   :  { %470 = dma.done.wait [#allocation9], 512  }
  0x13   :  { %471 = vsyncadd [#allocation9], 4294966784  ;;  %v323_v0 = vld [vmem:[#allocation5 + $0x8] sm:$0xff]  ;;  %v322_v1 = vld [vmem:[#allocation5] sm:$0xff]  ;;  %vm111_vm0 = vcmask 261120   ;;  %vm166_vm1 = vcmask 523264  }
  0x14   :  { %v327_v2 = vld [vmem:[#allocation7 + $0x18] sm:$0xff]  ;;  %121 = vmatpush.bf16.msra.mxu0 %v323_v0  ;;  %v89_v3 = vld [vmem:[#allocation2] sm:$0xff]  ;;  %v326_v4 = vld [vmem:[#allocation7 + $0x10] sm:$0xff]  ;;  %s267_s26 = sshll.u32 %s552_s7, 4  ;;  %s268_s26 = int_to_ptr.hbm [resolvable:$true] %s267_s26 }
  0x15   :  { %174 = vmatpush.bf16.msra.mxu1 %v327_v2  ;;  %v90_v5 = vpack.c.bf16 %v89_v3, %v89_v3  ;;  %v325_v6 = vld [vmem:[#allocation7 + $0x8] sm:$0xff]  ;;  %v324_v7 = vld [vmem:[#allocation7] sm:$0xff]  ;;  %v331_v8 = vld [vmem:[#allocation8 + $0x18] sm:$0xff] }
  0x16   :  { %228 = vmatpush.bf16.msra.mxu2 %v331_v8  ;;  %v330_v9 = vld [vmem:[#allocation8 + $0x10] sm:$0xff]  ;;  %v339_v10 = vld [vmem:[%s547_s2] ss:$0 sm:$0xff]  ;;  %v328_v17 = vld [vmem:[#allocation8] sm:$0xff] }
  0x17   :  { %v329_v16 = vld [vmem:[#allocation8 + $0x8] sm:$0xff] }
  0x18   :  { %122 = vmatpush.bf16.msra.mxu0 %v322_v1  ;;  %v340_v18 = vld [vmem:[%s549_s4] ss:$0 sm:$0xff]  ;;  %s480_s4 = smov [#allocation10]  }
  0x19   :  { %175 = vmatpush.bf16.msra.mxu1 %v326_v4  ;;  %v341_v24 = vld [vmem:[%s551_s6] ss:$0 sm:$0xff]  ;;  %s265_s6 = sshll.u32 %s480_s4, 4  ;;  %s266_s6 = int_to_ptr.vmem [resolvable:$true] %s265_s6 }
  0x1a   :  { %229 = vmatpush.bf16.msra.mxu2 %v330_v9 }
  0x1b   :  { %287 = vmatmul.msk.bf16.vlgmr.msra.gmra.mxu0 %vm111_vm0, %v90_v5 }
  0x1d   :  { %176 = vmatpush.bf16.msra.mxu1 %v325_v6 }
  0x1e   :  { %230 = vmatpush.bf16.msra.mxu2 %v329_v16 }
  0x21   :  { %177 = vmatpush.bf16.msra.mxu1 %v324_v7 }
  0x22   :  { %231 = vmatpush.bf16.msra.mxu2 %v328_v17 }
  0x98   :  { %v124_v11 = vpop.f32.mrf.mxu0 }
  0x99   :  { %v125_v12 = vadd.f32 %v339_v10, %v124_v11 }
  0x9b   :  { %v128_v13 = vmax.f32 %v125_v12, 0.0 }
  0x9d   :  { %v129_v14 = vpack.c.bf16 %v128_v13, %v128_v13 }
  0x9f   :  { %304 = vmatmul.msk.bf16.vlgmr.msra.gmra.mxu1 %vm166_vm1, %v129_v14 }
  0xa0   :  { %v126_v15 = vpop.f32.mrf.mxu0 }
 0x11c   :  { %v179_v19 = vpop.f32.mrf.mxu1 }
 0x11d   :  { %v180_v20 = vadd.f32 %v340_v18, %v179_v19 }
 0x11f   :  { %v183_v21 = vmax.f32 %v180_v20, 0.0 }
 0x121   :  { %v184_v22 = vpack.c.bf16 %v183_v21, %v183_v21 }
 0x123   :  { %321 = vmatmul.msk.bf16.vlgmr.msra.gmra.mxu2 %vm166_vm1, %v184_v22 }
 0x124   :  { %v181_v23 = vpop.f32.mrf.mxu1 }
 0x1a6   :  { %v233_v25 = vpop.f32.mrf.mxu2 }
 0x1a7   :  { %v234_v26 = vadd.f32 %v341_v24, %v233_v25 }
 0x1a9   :  { %237 = vmax.xlane.f32.xlu0 %v234_v26 }
 0x1ae   :  { %v235_v27 = vpop.f32.mrf.mxu2 }
 0x21c   :  { %v238_v28 = vpop.xlane.xlu0 %237 }
 0x21d   :  { %v239_v29 = vsub.f32 %v234_v26, %v238_v28 }
 0x21f   :  { %v240_v30 = vmul.f32 1.442695, %v239_v29 }
 0x221   :  { %342 = vpow2.f32 %v240_v30 }
 0x227   :  { %v343_v31 = vpop.eup %342 }
 0x228   :  { %242 = vadd.xlane.f32.xlu0 %v343_v31 }
 0x29b   :  { %v243_v32 = vpop.xlane.xlu0 %242 }
 0x29c   :  { %344 = vrcp.f32 %v243_v32  ;;  %v255_v36 = vand.u32 2147483648, %v243_v32  ;;  %v253_v38 = vand.u32 2147483647, %v243_v32  ;;  %vm249_vm3 = vweird.f32 %v243_v32 }
 0x29e   :  { %v256_v40 = vor.u32 1.1754944e-38, %v255_v36  ;;  %vm254_vm5 = vcmp.eq.f32.partialorder %v253_v38, 8.507059e+37 }
 0x2a2   :  { %v345_v33 = vpop.eup %344 }
 0x2a3   :  { %v245_v34 = vmul.f32 %v345_v33, %v243_v32  ;;  %vm250_vm2 = vweird.f32 %v345_v33 }
 0x2a4   :  { %vm251_vm4 = vmor %vm249_vm3, %vm250_vm2 }
 0x2a5   :  { %v246_v35 = vsub.f32 1.0, %v245_v34 }
 0x2a7   :  { %v247_v37 = vmul.f32 %v345_v33, %v246_v35 }
 0x2a9   :  { %v248_v39 = vadd.f32 %v345_v33, %v247_v37 }
 0x2ab   :  { %v252_v41 = vsel %vm251_vm4, %v345_v33, %v248_v39 }
 0x2ac   :  { %v257_v42 = vsel %vm254_vm5, %v256_v40, %v252_v41 }
 0x2ad   :  { %v258_v43 = vmul.f32 %v343_v31, %v257_v42 }
 0x2af   :  { %259 = vst [vmem:[#allocation10] sm:$0xff] %v258_v43 }
 0x2b0   :  { %270 = dma.vmem_to_hbm [thread:$0]  %s266_s6, 128, %s268_s26, [#allocation4]  }
 0x2b1   :  { %472 = dma.done.wait [#allocation4], 128  }
 0x2b2   :  { %473 = vsyncadd [#allocation4], 4294967168 }
 0x2b3   :  { %275 = vsyncpa [#allocation3], 1 }
 0x2b4   :  { %276 = vsyncpa [#allocation6], 1 }
 0x2b5   :  { %277 = vsyncpa [#allocation9], 1 }
 0x2b6   :  { %278 = vsyncpa [#allocation4], 1 }

</bundles_post_ra>
